<compile_context>
chip_gen: v6e
topology: v6e:2x2x1
jax: 0.10.0
libtpu: 0.0.40
codegen_flags: <defaults>
</compile_context>

<pallas_src>
import jax
import jax.numpy as jnp
from jax.experimental import pallas as pl
from jax.experimental.pallas import tpu as pltpu


def _round_up(a, b):
    return ((a + b - 1) // b) * b


def _gcn_mm_kernel(adj_ref, x_ref, o_ref):
    # adj_ref: (TV, W)   one row-tile of the (padded) adjacency
    # x_ref:   (W,  TM)  one lane-dense column-tile of x2
    # o_ref:   (TV, TM)  corresponding output tile
    o_ref[...] = jnp.dot(
        adj_ref[...], x_ref[...], preferred_element_type=jnp.float32
    ).astype(o_ref.dtype)


def _gcn_mm_acc_kernel(adj_ref, x_ref, o_ref, acc_ref):
    # K-tiled variant (large W): accumulate in f32 scratch across the k axis.
    @pl.when(pl.program_id(2) == 0)
    def _():
        acc_ref[...] = jnp.zeros_like(acc_ref)

    acc_ref[...] += jnp.dot(
        adj_ref[...], x_ref[...], preferred_element_type=jnp.float32
    )

    @pl.when(pl.program_id(2) == pl.num_programs(2) - 1)
    def _():
        o_ref[...] = acc_ref[...].astype(o_ref.dtype)


def gcn_forward(x, adj, *, lane_tile_max=2048, v_tile_max=512, k_tile_max=1024,
                vmem_budget_bytes=32 * 1024 * 1024):
    """x: (N, C, W, L), adj: (V, W) -> (N, C, V, L),
    matching torch.einsum('ncwl,vw->ncvl', (x, adj))."""
    N, C, W, L = x.shape
    V, W2 = adj.shape
    assert W == W2, "adj second dim must match x's third dim (w)"

    out_dtype = jnp.result_type(x.dtype, adj.dtype)
    M = N * C * L

    # Lane-dense 2-D view of x: (W, M) with M = N*C*L on the lane axis.
    x2 = jnp.transpose(x, (2, 0, 1, 3)).reshape(W, M)

    # --- tile / pad sizes -------------------------------------------------
    # M (lane) tile: multiple of 128, at most lane_tile_max wide.
    TM = _round_up(min(lane_tile_max, _round_up(M, 128)), 128)
    # V (sublane) tile: multiple of 8, at most v_tile_max rows.
    TV = _round_up(min(v_tile_max, _round_up(V, 8)), 8)

    single_k = W <= k_tile_max
    if single_k:
        TK = W_pad = W                      # contraction dim stays resident
    else:
        TK = k_tile_max                     # multiple of 128
        W_pad = _round_up(W, TK)

    # Shrink TM if the double-buffered VMEM estimate exceeds the budget.
    def _vmem_est(tm):
        adj_b = TV * TK * jnp.dtype(adj.dtype).itemsize * 2
        x_b = TK * tm * jnp.dtype(x.dtype).itemsize * 2
        out_b = TV * tm * jnp.dtype(out_dtype).itemsize * 2
        acc_b = 0 if single_k else TV * tm * 4
        return adj_b + x_b + out_b + acc_b

    while TM > 128 and _vmem_est(TM) > vmem_budget_bytes:
        TM -= 128

    M_pad = _round_up(M, TM)
    V_pad = _round_up(V, TV)

    # Zero-pad (padded rows/cols produce zeros that are sliced off below).
    adj_p = adj
    if V_pad != V or W_pad != W:
        adj_p = jnp.pad(adj, ((0, V_pad - V), (0, W_pad - W)))
    x2_p = x2
    if M_pad != M or W_pad != W:
        x2_p = jnp.pad(x2, ((0, W_pad - W), (0, M_pad - M)))

    if single_k:
        grid = (V_pad // TV, M_pad // TM)
        out_p = pl.pallas_call(
            _gcn_mm_kernel,
            out_shape=jax.ShapeDtypeStruct((V_pad, M_pad), out_dtype),
            grid_spec=pltpu.PrefetchScalarGridSpec(
                num_scalar_prefetch=0,
                grid=grid,
                in_specs=[
                    pl.BlockSpec((TV, W_pad), lambda i, j: (i, 0)),
                    pl.BlockSpec((W_pad, TM), lambda i, j: (0, j)),
                ],
                out_specs=pl.BlockSpec((TV, TM), lambda i, j: (i, j)),
            ),
            compiler_params=pltpu.CompilerParams(
                dimension_semantics=("parallel", "parallel"),
                vmem_limit_bytes=48 * 1024 * 1024,
            ),
        )(adj_p, x2_p)
    else:
        grid = (V_pad // TV, M_pad // TM, W_pad // TK)
        out_p = pl.pallas_call(
            _gcn_mm_acc_kernel,
            out_shape=jax.ShapeDtypeStruct((V_pad, M_pad), out_dtype),
            grid_spec=pltpu.PrefetchScalarGridSpec(
                num_scalar_prefetch=0,
                grid=grid,
                in_specs=[
                    pl.BlockSpec((TV, TK), lambda i, j, k: (i, k)),
                    pl.BlockSpec((TK, TM), lambda i, j, k: (k, j)),
                ],
                out_specs=pl.BlockSpec((TV, TM), lambda i, j, k: (i, j)),
                scratch_shapes=[pltpu.VMEM((TV, TM), jnp.float32)],
            ),
            compiler_params=pltpu.CompilerParams(
                dimension_semantics=("parallel", "parallel", "arbitrary"),
                vmem_limit_bytes=48 * 1024 * 1024,
            ),
        )(adj_p, x2_p)

    # Strip padding and restore the (N, C, V, L) layout.
    out2 = out_p[:V, :M]
    return out2.reshape(V, N, C, L).transpose(1, 2, 0, 3)


if __name__ == "__main__":
    key = jax.random.PRNGKey(0)
    k1, k2 = jax.random.split(key)

    # Small shapes consistent with the module: x is NCWL, adj is (V, W).
    N, C, W, L, V = 2, 4, 16, 16, 16
    x = jax.random.normal(k1, (N, C, W, L), dtype=jnp.float32)
    adj = jax.random.normal(k2, (V, W), dtype=jnp.float32)

    out = gcn_forward(x, adj)
    jax.block_until_ready(out)

    # Reference check against plain-JAX einsum (same semantics as torch.einsum).
    ref = jnp.einsum('ncwl,vw->ncvl', x, adj)
    assert out.shape == (N, C, V, L)
    assert jnp.allclose(out, ref, atol=1e-5, rtol=1e-5)

    print("KERNEL_OK")
</pallas_src>

<mosaic_0001>
module attributes {stable_mosaic.version = 11 : i64} {
  func.func @_gcn_mm_kernel(%arg0: i32, %arg1: i32, %arg2: memref<16x16xf32, #tpu.memory_space<vmem>>, %arg3: memref<16x128xf32, #tpu.memory_space<vmem>>, %arg4: memref<16x128xf32, #tpu.memory_space<vmem>>) attributes {dimension_semantics = [#tpu.dimension_semantics<parallel>, #tpu.dimension_semantics<parallel>], iteration_bounds = array<i64: 1, 1>, scalar_prefetch = 0 : i64, scratch_operands = 0 : i64, tpu.core_type = #tpu.core_type<tc>, window_params = [{transform_indices = @transform_0, window_bounds = array<i64: 16, 16>}, {transform_indices = @transform_1, window_bounds = array<i64: 16, 128>}, {transform_indices = @transform_2, window_bounds = array<i64: 16, 128>}]} {
    %c0 = arith.constant 0 : index
    %c0_0 = arith.constant 0 : index
    %0 = vector.load %arg2[%c0, %c0_0] : memref<16x16xf32, #tpu.memory_space<vmem>>, vector<16x16xf32>
    %c0_1 = arith.constant 0 : index
    %c0_2 = arith.constant 0 : index
    %1 = vector.load %arg3[%c0_1, %c0_2] : memref<16x128xf32, #tpu.memory_space<vmem>>, vector<16x128xf32>
    %cst = arith.constant dense<0.000000e+00> : vector<16x128xf32>
    %2 = tpu.matmul %0, %1, %cst {dimension_numbers = #tpu.dot_dimension_numbers<[1], [0], [0], [1], [0, 0, 1, 1], [], []>} : vector<16x16xf32>, vector<16x128xf32>, vector<16x128xf32> -> vector<16x128xf32>
    %c0_3 = arith.constant 0 : index
    %c0_4 = arith.constant 0 : index
    %3 = vector.load %arg4[%c0_3, %c0_4] : memref<16x128xf32, #tpu.memory_space<vmem>>, vector<16x128xf32>
    tpu.vector_store %arg4[%c0_3, %c0_4], %2 {strides = array<i32>} : memref<16x128xf32, #tpu.memory_space<vmem>>, vector<16x128xf32>,
    return
  }
  func.func @transform_0(%arg0: i32, %arg1: i32) -> (i32, i32) {
    %c0_i32 = arith.constant 0 : i32
    %c0_i32_0 = arith.constant 0 : i32
    return %arg0, %c0_i32 : i32, i32
  }
  func.func @transform_1(%arg0: i32, %arg1: i32) -> (i32, i32) {
    %c0_i32 = arith.constant 0 : i32
    %c0_i32_0 = arith.constant 0 : i32
    return %c0_i32, %arg1 : i32, i32
  }
  func.func @transform_2(%arg0: i32, %arg1: i32) -> (i32, i32) {
    %c0_i32 = arith.constant 0 : i32
    return %arg0, %arg1 : i32, i32
  }
}

</mosaic_0001>

<bundles_post_ra>
// kernel: tpu_custom_call.1
= control target key start
LH: loop header
LB: loop body
LE: loop exit
PB: predicated region body
PF: predicated region fallthrough
CT: control target
= control target key end

     0   :  { %7 = vsyncpa [#allocation3], 0  ;;  %s268_s0 = inlined_call_operand.hbm [shape: f32[16,16], index: 0, kind: input, shape index: {}]   ;;  %s269_s1 = inlined_call_operand.hbm [shape: f32[16,128], index: 1, kind: input, shape index: {}]   ;;  %s270_s2 = inlined_call_operand.hbm [shape: f32[16,128], index: 2, kind: output, shape index: {}]  }
   0x1   :  { %8 = vsyncpa [#allocation6], 0 }
   0x2   :  { %9 = vsyncpa [#allocation4], 0  ;;  %s230_s9 = smov [#allocation2]  }
   0x3   :  { %s15_s10 = sshll.u32 %s230_s9, 4  ;;  %s16_s10 = int_to_ptr.vmem [resolvable:$true] %s15_s10 }
   0x4   :  { %s172_s11 = scalar_lea.vmem %s16_s10, 256  ;;  %p177_p1 = scmp.lt.s32.totalorder %s16_s10, %s16_s10 }
   0x5   :  { %p173_p0 = scmp.ne.s32.totalorder %s16_s10, %s172_s11  ;;  %p178_p2 = scmp.lt.s32.totalorder %s172_s11, %s172_s11 }
   0x7   :  { %p179_p3 = por %p178_p2, %p177_p1 }
   0x9   :  { %p180_p4 = pnand %p179_p3, %p173_p0 }
   0xb   :  { %183 = shalt.err (!%p180_p4)
}
   0xc   :  { %s231_s12 = smov 128   ;;  %s232_s13 = smov 8  }
   0xd   :  { %21 = dma.hbm_to_vmem [thread:$0]  %s268_s0, 256, %s16_s10, [#allocation3], %s231_s12, %s231_s12, %s232_s13  }
   0xe   :  { %s233_s16 = smov [#allocation5]  }
   0xf   :  { %s27_s17 = sshll.u32 %s233_s16, 4  ;;  %s28_s17 = int_to_ptr.vmem [resolvable:$true] %s27_s17 }
  0x10   :  { %s192_s18 = scalar_lea.vmem %s28_s17, 256  ;;  %p197_p6 = scmp.lt.s32.totalorder %s28_s17, %s28_s17 }
  0x11   :  { %p193_p5 = scmp.ne.s32.totalorder %s28_s17, %s192_s18  ;;  %p198_p7 = scmp.lt.s32.totalorder %s192_s18, %s192_s18 }
  0x13   :  { %p199_p8 = por %p198_p7, %p197_p6 }
  0x15   :  { %p200_p9 = pnand %p199_p8, %p193_p5 }
  0x17   :  { %203 = shalt.err (!%p200_p9)
}
  0x18   :  { %33 = dma.hbm_to_vmem [thread:$0]  %s269_s1, 256, %s28_s17, [#allocation6], %s231_s12, %s231_s12, %s232_s13  }
  0x19   :  { %224 = dma.done.wait [#allocation3], 256  }
  0x1a   :  { %225 = vsyncadd [#allocation3], 4294967040 }
  0x1b   :  { %226 = dma.done.wait [#allocation6], 256  }
  0x1c   :  { %227 = vsyncadd [#allocation6], 4294967040  ;;  %vm44_vm0 = vcmask 130048   ;;  %v43_v0 = vld [vmem:[#allocation5 + $0x8] sm:$0xff]  ;;  %v42_v1 = vld [vmem:[#allocation5] sm:$0xff]  ;;  %s234_s0 = smov [#allocation7]  }
  0x1d   :  { %v40_v2 = vld [vmem:[#allocation2] sm:$0xff]  ;;  %152 = vmatprep.subr.mxu0 %v43_v0  ;;  %v41_v3 = vld [vmem:[#allocation2 + $0x8] sm:$0xff]  ;;  %s133_s21 = sshll.u32 %s234_s0, 4  ;;  %s134_s21 = int_to_ptr.vmem [resolvable:$true] %s133_s21 }
  0x1e   :  { %156 = vmatprep.mubr.msk.f32.mxu0 %vm44_vm0, %v40_v2  ;;  %153 = vmatpush3.msra.mxu0 %v43_v0  ;;  %s204_s1 = scalar_lea.vmem %s134_s21, 256  ;;  %p209_p11 = scmp.lt.s32.totalorder %s134_s21, %s134_s21 }
  0x1f   :  { %154 = vmatprep.subr.mxu0 %v42_v1  ;;  %p205_p10 = scmp.ne.s32.totalorder %s134_s21, %s204_s1  ;;  %p210_p12 = scmp.lt.s32.totalorder %s204_s1, %s204_s1 }
  0x20   :  { %155 = vmatpush3.msra.mxu0 %v42_v1 }
  0x21   :  { %157 = vmatmul.mubr.msk.f32.vlgmr.msra.gmra.mxu0 %vm44_vm0, %v41_v3  ;;  %p211_p13 = por %p210_p12, %p209_p11 }
  0x23   :  { %p212_p0 = pnand %p211_p13, %p205_p10 }
  0xe1   :  { %v158_v4 = vpop.f32.mrf.mxu0 }
  0xe2   :  { %127 = vst [vmem:[#allocation7 + $0x8] sm:$0xff] %v158_v4 }
  0xe3   :  { %v117_v5 = vpop.f32.mrf.mxu0 }
  0xe4   :  { %126 = vst [vmem:[#allocation7] sm:$0xff] %v117_v5 }
  0xe5   :  { %215 = shalt.err (!%p212_p0)
}
  0xe6   :  { %139 = dma.vmem_to_hbm [thread:$0]  %s134_s21, 256, %s270_s2, [#allocation4], %s231_s12, %s231_s12, %s232_s13  }
  0xe7   :  { %228 = dma.done.wait [#allocation4], 256  }
  0xe8   :  { %229 = vsyncadd [#allocation4], 4294967040 }
  0xe9   :  { %143 = vsyncpa [#allocation3], 1 }
  0xea   :  { %144 = vsyncpa [#allocation6], 1 }
  0xeb   :  { %145 = vsyncpa [#allocation4], 1 }

</bundles_post_ra>
